<compile_context>
chip_gen: v6e
topology: v6e:2x2x1
jax: 0.10.0
libtpu: 0.0.40
codegen_flags: <defaults>
</compile_context>

<pallas_src>
import functools

import jax
import jax.numpy as jnp
from jax.experimental import pallas as pl
from jax.experimental.pallas import tpu as pltpu


def _vmem_capacity_bytes():
    try:
        return int(pltpu.get_tpu_info().vmem_capacity_bytes)
    except Exception:
        return 64 << 20  # conservative ceiling (v7x per-TC)


def mlp3_kernel(x_ref, w1_ref, b1_ref, w2_ref, b2_ref, w3_ref, b3_ref,
                o_ref, h1_scr, h2_scr):
    # fc1 / fc2 only need to run once per batch tile (j == 0); their results
    # are staged in bf16 VMEM scratch and reused across all output-N tiles.
    @pl.when(pl.program_id(1) == 0)
    def _():
        x = x_ref[...].astype(w1_ref.dtype)          # per-tile cast to bf16
        h1 = jnp.dot(x, w1_ref[...], preferred_element_type=jnp.float32)
        h1 = jnp.maximum(h1 + b1_ref[...], 0.0)      # bias + ReLU in f32 (VPU)
        h1_scr[...] = h1.astype(h1_scr.dtype)        # stage bf16

        h2 = jnp.dot(h1_scr[...], w2_ref[...],
                     preferred_element_type=jnp.float32)
        h2 = jnp.maximum(h2 + b2_ref[...], 0.0)
        h2_scr[...] = h2.astype(h2_scr.dtype)        # stage bf16

    out = jnp.dot(h2_scr[...], w3_ref[...], preferred_element_type=jnp.float32)
    o_ref[...] = (out + b3_ref[...]).astype(o_ref.dtype)


@functools.partial(jax.jit,
                   static_argnames=("out_dim", "tile_m", "tile_n", "out_dtype"))
def mlp_forward(x, w1, b1, w2, b2, w3, b3, *, out_dim,
                tile_m=256, tile_n=None, out_dtype=None):
    """x: (B, in) f32/bf16. Weights already bf16 (in, out); biases f32 (1, out).

    W3 / b3 are already lane-padded (out_pad = multiple of 128); `out_dim` is
    the true output width and is sliced at the end.
    """
    B, in_dim = x.shape
    hidden = w1.shape[1]
    hidden2 = w2.shape[1]
    out_pad = w3.shape[1]
    out_dtype = x.dtype if out_dtype is None else jnp.dtype(out_dtype)
    cbytes = jnp.dtype(w1.dtype).itemsize          # compute dtype (bf16) bytes

    # Clamp the batch tile for small B (multiple of 16 for bf16 sublane packing).
    tile_m_eff = min(tile_m, max(16, ((B + 15) // 16) * 16))

    vmem_cap = _vmem_capacity_bytes()

    def need(tm, tn, w3_resident):
        w_res = (in_dim * hidden + hidden * hidden2) * cbytes      # Buffered(1)
        w3_bytes = hidden2 * tn * cbytes * (1 if w3_resident else 2)
        bias = 8 * (hidden + hidden2 + tn) * 4      # (1,N) pads to (8,N) f32
        x_tile = 2 * tm * in_dim * jnp.dtype(x.dtype).itemsize     # double-buf
        out_tile = 2 * tm * tn * jnp.dtype(out_dtype).itemsize     # double-buf
        scratch = tm * (hidden + hidden2) * cbytes                 # bf16 h1/h2
        return w_res + w3_bytes + bias + x_tile + out_tile + scratch

    # Auto-pick tile_n: keep W3 fully resident unless the budget says otherwise
    # (the v7x 64 MiB/TC case) — then N-tile in lane-dense 128-multiples.
    if tile_n is None:
        tile_n = out_pad
        while (need(tile_m_eff, tile_n, tile_n == out_pad) > 0.7 * vmem_cap
               and tile_n > 128 and tile_n % 256 == 0):
            tile_n //= 2
        while (need(tile_m_eff, tile_n, tile_n == out_pad) > 0.7 * vmem_cap
               and tile_m_eff > 128):
            tile_m_eff //= 2
    num_n = out_pad // tile_n
    grid = (pl.cdiv(B, tile_m_eff), num_n)

    total_need = need(tile_m_eff, tile_n, num_n == 1)
    vmem_limit = int(min(vmem_cap, max(32 << 20, int(1.25 * total_need))))

    flops = 2 * B * (in_dim * hidden + hidden * hidden2 + hidden2 * out_pad)
    bytes_accessed = (B * in_dim * jnp.dtype(x.dtype).itemsize
                      + (in_dim * hidden + hidden * hidden2
                         + hidden2 * out_pad) * cbytes
                      + (hidden + hidden2 + out_pad) * 4
                      + B * out_pad * jnp.dtype(out_dtype).itemsize)
    cost = pl.CostEstimate(flops=flops, transcendentals=0,
                           bytes_accessed=bytes_accessed)

    resident = dict(pipeline_mode=pl.Buffered(1))   # constant index_map inputs
    if num_n == 1:
        w3_spec = pl.BlockSpec((hidden2, tile_n), lambda i, j: (0, 0), **resident)
        b3_spec = pl.BlockSpec((1, tile_n), lambda i, j: (0, 0), **resident)
    else:
        w3_spec = pl.BlockSpec((hidden2, tile_n), lambda i, j: (0, j))
        b3_spec = pl.BlockSpec((1, tile_n), lambda i, j: (0, j))

    out = pl.pallas_call(
        mlp3_kernel,
        out_shape=jax.ShapeDtypeStruct((B, out_pad), out_dtype),
        grid_spec=pltpu.PrefetchScalarGridSpec(
            num_scalar_prefetch=0,
            grid=grid,
            in_specs=[
                pl.BlockSpec((tile_m_eff, in_dim), lambda i, j: (i, 0)),  # x tile
                pl.BlockSpec((in_dim, hidden), lambda i, j: (0, 0), **resident),
                pl.BlockSpec((1, hidden), lambda i, j: (0, 0), **resident),
                pl.BlockSpec((hidden, hidden2), lambda i, j: (0, 0), **resident),
                pl.BlockSpec((1, hidden2), lambda i, j: (0, 0), **resident),
                w3_spec,
                b3_spec,
            ],
            out_specs=pl.BlockSpec((tile_m_eff, tile_n), lambda i, j: (i, j)),
            scratch_shapes=[
                pltpu.VMEM((tile_m_eff, hidden), w1.dtype),    # h1 (bf16)
                pltpu.VMEM((tile_m_eff, hidden2), w2.dtype),   # h2 (bf16)
            ],
        ),
        compiler_params=pltpu.CompilerParams(
            dimension_semantics=("parallel", "arbitrary"),
            vmem_limit_bytes=vmem_limit,
        ),
        cost_estimate=cost,
    )(x, w1, b1, w2, b2, w3, b3)

    if out_pad != out_dim:
        out = out[:, :out_dim]
    return out


def init_params(key, input_size, hidden_size, output_size, dtype=jnp.float32):
    """nn.Linear-style uniform(-1/sqrt(fan_in), 1/sqrt(fan_in)) init.

    Weights stored as (in, out) — transposed vs PyTorch's (out, in).
    """
    hidden2 = hidden_size // 2
    ks = jax.random.split(key, 6)
    bnd1 = 1.0 / (input_size ** 0.5)
    bnd2 = 1.0 / (hidden_size ** 0.5)
    bnd3 = 1.0 / (hidden2 ** 0.5)
    w1 = jax.random.uniform(ks[0], (input_size, hidden_size), dtype, -bnd1, bnd1)
    b1 = jax.random.uniform(ks[1], (hidden_size,), dtype, -bnd1, bnd1)
    w2 = jax.random.uniform(ks[2], (hidden_size, hidden2), dtype, -bnd2, bnd2)
    b2 = jax.random.uniform(ks[3], (hidden2,), dtype, -bnd2, bnd2)
    w3 = jax.random.uniform(ks[4], (hidden2, output_size), dtype, -bnd3, bnd3)
    b3 = jax.random.uniform(ks[5], (output_size,), dtype, -bnd3, bnd3)
    return w1, b1, w2, b2, w3, b3


def prepare_params(w1, b1, w2, b2, w3, b3, compute_dtype=jnp.bfloat16):
    """One-time: cast weights to the MXU compute dtype, keep biases in f32,
    lane-pad the output layer to a multiple of 128. Done once, not per call."""
    out_dim = w3.shape[1]
    out_pad = ((out_dim + 127) // 128) * 128
    w1c = jnp.asarray(w1, compute_dtype)
    w2c = jnp.asarray(w2, compute_dtype)
    w3c = jnp.asarray(w3, compute_dtype)
    b1f = jnp.asarray(b1, jnp.float32).reshape(1, -1)
    b2f = jnp.asarray(b2, jnp.float32).reshape(1, -1)
    b3f = jnp.asarray(b3, jnp.float32).reshape(1, -1)
    if out_pad != out_dim:
        w3c = jnp.pad(w3c, ((0, 0), (0, out_pad - out_dim)))
        b3f = jnp.pad(b3f, ((0, 0), (0, out_pad - out_dim)))
    # TODO(synk): optional int8 weight quantization path for v5e/v6e MXUs.
    return (w1c, b1f, w2c, b2f, w3c, b3f), out_dim


if __name__ == "__main__":
    # Small version of multi_Linear(512, 512, 1000); batch and output_size are
    # deliberately NOT multiples of the tile sizes to exercise the masked
    # partial-batch block and the lane-padding path.
    batch = 50
    input_size = 128
    hidden_size = 256        # fc2 output = hidden_size // 2 = 128
    output_size = 200

    key = jax.random.PRNGKey(0)
    kx, kp = jax.random.split(key)
    x = jax.random.normal(kx, (batch, input_size), jnp.float32)
    w1, b1, w2, b2, w3, b3 = init_params(kp, input_size, hidden_size, output_size)
    params, out_dim = prepare_params(w1, b1, w2, b2, w3, b3)

    out = mlp_forward(x, *params, out_dim=out_dim)
    jax.block_until_ready(out)
    assert out.shape == (batch, output_size), out.shape

    # Reference in plain JAX using the same numerics (bf16 operands, f32 accum).
    cd = jnp.bfloat16
    h1 = jnp.maximum(
        jnp.dot(x.astype(cd), w1.astype(cd), preferred_element_type=jnp.float32)
        + b1.reshape(1, -1), 0.0)
    h2 = jnp.maximum(
        jnp.dot(h1.astype(cd), w2.astype(cd), preferred_element_type=jnp.float32)
        + b2.reshape(1, -1), 0.0)
    ref = (jnp.dot(h2.astype(cd), w3.astype(cd),
                   preferred_element_type=jnp.float32) + b3.reshape(1, -1))

    assert jnp.allclose(out, ref, atol=2e-2, rtol=2e-2), (
        float(jnp.max(jnp.abs(out - ref))))

    print("KERNEL_OK")
</pallas_src>

<mosaic_0001>
module attributes {stable_mosaic.version = 11 : i64} {
  func.func @mlp3_kernel(%arg0: i32, %arg1: i32, %arg2: memref<64x128xf32, #tpu.memory_space<vmem>>, %arg3: memref<128x256xbf16, #tpu.memory_space<vmem>>, %arg4: memref<1x256xf32, #tpu.memory_space<vmem>>, %arg5: memref<256x128xbf16, #tpu.memory_space<vmem>>, %arg6: memref<1x128xf32, #tpu.memory_space<vmem>>, %arg7: memref<128x256xbf16, #tpu.memory_space<vmem>>, %arg8: memref<1x256xf32, #tpu.memory_space<vmem>>, %arg9: memref<64x256xf32, #tpu.memory_space<vmem>>, %arg10: memref<64x256xbf16, #tpu.memory_space<vmem>>, %arg11: memref<64x128xbf16, #tpu.memory_space<vmem>>) attributes {dimension_semantics = [#tpu.dimension_semantics<parallel>, #tpu.dimension_semantics<arbitrary>], iteration_bounds = array<i64: 1, 1>, scalar_prefetch = 0 : i64, scratch_operands = 2 : i64, tpu.core_type = #tpu.core_type<tc>, window_params = [{transform_indices = @transform_0, window_bounds = array<i64: 64, 128>}, {pipeline_mode = #tpu.pipeline_mode<synchronous>, transform_indices = @transform_1, window_bounds = array<i64: 128, 256>}, {pipeline_mode = #tpu.pipeline_mode<synchronous>, transform_indices = @transform_2, window_bounds = array<i64: 1, 256>}, {pipeline_mode = #tpu.pipeline_mode<synchronous>, transform_indices = @transform_3, window_bounds = array<i64: 256, 128>}, {pipeline_mode = #tpu.pipeline_mode<synchronous>, transform_indices = @transform_4, window_bounds = array<i64: 1, 128>}, {pipeline_mode = #tpu.pipeline_mode<synchronous>, transform_indices = @transform_5, window_bounds = array<i64: 128, 256>}, {pipeline_mode = #tpu.pipeline_mode<synchronous>, transform_indices = @transform_6, window_bounds = array<i64: 1, 256>}, {transform_indices = @transform_7, window_bounds = array<i64: 64, 256>}]} {
    %c0_i32 = arith.constant 0 : i32
    %0 = arith.cmpi eq, %arg1, %c0_i32 : i32
    %1 = arith.extui %0 : i1 to i32
    %c0_i32_0 = arith.constant 0 : i32
    %2 = arith.cmpi ne, %1, %c0_i32_0 : i32
    scf.if %2 {
      %c0_8 = arith.constant 0 : index
      %c0_9 = arith.constant 0 : index
      %10 = vector.load %arg2[%c0_8, %c0_9] : memref<64x128xf32, #tpu.memory_space<vmem>>, vector<64x128xf32>
      %11 = arith.truncf %10 : vector<64x128xf32> to vector<64x128xbf16>
      %c0_10 = arith.constant 0 : index
      %c0_11 = arith.constant 0 : index
      %12 = vector.load %arg3[%c0_10, %c0_11] : memref<128x256xbf16, #tpu.memory_space<vmem>>, vector<128x256xbf16>
      %cst_12 = arith.constant dense<0.000000e+00> : vector<64x256xf32>
      %13 = tpu.matmul %11, %12, %cst_12 {dimension_numbers = #tpu.dot_dimension_numbers<[1], [0], [0], [1], [0, 0, 1, 1], [], []>} : vector<64x128xbf16>, vector<128x256xbf16>, vector<64x256xf32> -> vector<64x256xf32>
      %c0_13 = arith.constant 0 : index
      %c0_14 = arith.constant 0 : index
      %14 = vector.load %arg4[%c0_13, %c0_14] : memref<1x256xf32, #tpu.memory_space<vmem>>, vector<1x256xf32>
      %15 = vector.broadcast %14 : vector<1x256xf32> to vector<64x256xf32>
      %16 = arith.addf %13, %15 : vector<64x256xf32>
      %cst_15 = arith.constant 0.000000e+00 : f32
      %17 = vector.broadcast %cst_15 : f32 to vector<64x256xf32>
      %18 = arith.maximumf %16, %17 : vector<64x256xf32>
      %19 = arith.truncf %18 : vector<64x256xf32> to vector<64x256xbf16>
      %c0_16 = arith.constant 0 : index
      %c0_17 = arith.constant 0 : index
      %20 = vector.load %arg10[%c0_16, %c0_17] : memref<64x256xbf16, #tpu.memory_space<vmem>>, vector<64x256xbf16>
      tpu.vector_store %arg10[%c0_16, %c0_17], %19 {strides = array<i32>} : memref<64x256xbf16, #tpu.memory_space<vmem>>, vector<64x256xbf16>,
      %c0_18 = arith.constant 0 : index
      %c0_19 = arith.constant 0 : index
      %21 = vector.load %arg10[%c0_18, %c0_19] : memref<64x256xbf16, #tpu.memory_space<vmem>>, vector<64x256xbf16>
      %c0_20 = arith.constant 0 : index
      %c0_21 = arith.constant 0 : index
      %22 = vector.load %arg5[%c0_20, %c0_21] : memref<256x128xbf16, #tpu.memory_space<vmem>>, vector<256x128xbf16>
      %cst_22 = arith.constant dense<0.000000e+00> : vector<64x128xf32>
      %23 = tpu.matmul %21, %22, %cst_22 {dimension_numbers = #tpu.dot_dimension_numbers<[1], [0], [0], [1], [0, 0, 1, 1], [], []>} : vector<64x256xbf16>, vector<256x128xbf16>, vector<64x128xf32> -> vector<64x128xf32>
      %c0_23 = arith.constant 0 : index
      %c0_24 = arith.constant 0 : index
      %24 = vector.load %arg6[%c0_23, %c0_24] : memref<1x128xf32, #tpu.memory_space<vmem>>, vector<1x128xf32>
      %25 = vector.broadcast %24 : vector<1x128xf32> to vector<64x128xf32>
      %26 = arith.addf %23, %25 : vector<64x128xf32>
      %cst_25 = arith.constant 0.000000e+00 : f32
      %27 = vector.broadcast %cst_25 : f32 to vector<64x128xf32>
      %28 = arith.maximumf %26, %27 : vector<64x128xf32>
      %29 = arith.truncf %28 : vector<64x128xf32> to vector<64x128xbf16>
      %c0_26 = arith.constant 0 : index
      %c0_27 = arith.constant 0 : index
      %30 = vector.load %arg11[%c0_26, %c0_27] : memref<64x128xbf16, #tpu.memory_space<vmem>>, vector<64x128xbf16>
      tpu.vector_store %arg11[%c0_26, %c0_27], %29 {strides = array<i32>} : memref<64x128xbf16, #tpu.memory_space<vmem>>, vector<64x128xbf16>,
    } else {
    }
    %c0 = arith.constant 0 : index
    %c0_1 = arith.constant 0 : index
    %3 = vector.load %arg11[%c0, %c0_1] : memref<64x128xbf16, #tpu.memory_space<vmem>>, vector<64x128xbf16>
    %c0_2 = arith.constant 0 : index
    %c0_3 = arith.constant 0 : index
    %4 = vector.load %arg7[%c0_2, %c0_3] : memref<128x256xbf16, #tpu.memory_space<vmem>>, vector<128x256xbf16>
    %cst = arith.constant dense<0.000000e+00> : vector<64x256xf32>
    %5 = tpu.matmul %3, %4, %cst {dimension_numbers = #tpu.dot_dimension_numbers<[1], [0], [0], [1], [0, 0, 1, 1], [], []>} : vector<64x128xbf16>, vector<128x256xbf16>, vector<64x256xf32> -> vector<64x256xf32>
    %c0_4 = arith.constant 0 : index
    %c0_5 = arith.constant 0 : index
    %6 = vector.load %arg8[%c0_4, %c0_5] : memref<1x256xf32, #tpu.memory_space<vmem>>, vector<1x256xf32>
    %7 = vector.broadcast %6 : vector<1x256xf32> to vector<64x256xf32>
    %8 = arith.addf %5, %7 : vector<64x256xf32>
    %c0_6 = arith.constant 0 : index
    %c0_7 = arith.constant 0 : index
    %9 = vector.load %arg9[%c0_6, %c0_7] : memref<64x256xf32, #tpu.memory_space<vmem>>, vector<64x256xf32>
    tpu.vector_store %arg9[%c0_6, %c0_7], %8 {strides = array<i32>} : memref<64x256xf32, #tpu.memory_space<vmem>>, vector<64x256xf32>,
    return
  }
  func.func @transform_0(%arg0: i32, %arg1: i32) -> (i32, i32) {
    %c0_i32 = arith.constant 0 : i32
    %c0_i32_0 = arith.constant 0 : i32
    return %arg0, %c0_i32 : i32, i32
  }
  func.func @transform_1(%arg0: i32, %arg1: i32) -> (i32, i32) {
    %c0_i32 = arith.constant 0 : i32
    %c0_i32_0 = arith.constant 0 : i32
    %c0_i32_1 = arith.constant 0 : i32
    return %c0_i32, %c0_i32_0 : i32, i32
  }
  func.func @transform_2(%arg0: i32, %arg1: i32) -> (i32, i32) {
    %c0_i32 = arith.constant 0 : i32
    %c0_i32_0 = arith.constant 0 : i32
    %c0_i32_1 = arith.constant 0 : i32
    return %c0_i32, %c0_i32_0 : i32, i32
  }
  func.func @transform_3(%arg0: i32, %arg1: i32) -> (i32, i32) {
    %c0_i32 = arith.constant 0 : i32
    %c0_i32_0 = arith.constant 0 : i32
    %c0_i32_1 = arith.constant 0 : i32
    return %c0_i32, %c0_i32_0 : i32, i32
  }
  func.func @transform_4(%arg0: i32, %arg1: i32) -> (i32, i32) {
    %c0_i32 = arith.constant 0 : i32
    %c0_i32_0 = arith.constant 0 : i32
    %c0_i32_1 = arith.constant 0 : i32
    return %c0_i32, %c0_i32_0 : i32, i32
  }
  func.func @transform_5(%arg0: i32, %arg1: i32) -> (i32, i32) {
    %c0_i32 = arith.constant 0 : i32
    %c0_i32_0 = arith.constant 0 : i32
    %c0_i32_1 = arith.constant 0 : i32
    return %c0_i32, %c0_i32_0 : i32, i32
  }
  func.func @transform_6(%arg0: i32, %arg1: i32) -> (i32, i32) {
    %c0_i32 = arith.constant 0 : i32
    %c0_i32_0 = arith.constant 0 : i32
    %c0_i32_1 = arith.constant 0 : i32
    return %c0_i32, %c0_i32_0 : i32, i32
  }
  func.func @transform_7(%arg0: i32, %arg1: i32) -> (i32, i32) {
    %c0_i32 = arith.constant 0 : i32
    return %arg0, %arg1 : i32, i32
  }
}

</mosaic_0001>

<bundles_post_ra>
// kernel: mlp_forward.1
= control target key start
LH: loop header
LB: loop body
LE: loop exit
PB: predicated region body
PF: predicated region fallthrough
CT: control target
= control target key end

     0   :  { %12 = vsyncpa [#allocation5], 0  ;;  %s1369_s0 = inlined_call_operand.hbm [shape: f32[50,128], index: 0, kind: input, shape index: {}]   ;;  %s1370_s1 = inlined_call_operand.hbm [shape: bf16[128,256], index: 1, kind: input, shape index: {}]   ;;  %s1371_s2 = inlined_call_operand.vmem [shape: f32[1,256], index: 2, kind: input, shape index: {}]   ;;  %s1372_s3 = inlined_call_operand.hbm [shape: bf16[256,128], index: 3, kind: input, shape index: {}]   ;;  %s1373_s4 = inlined_call_operand.vmem [shape: f32[1,128], index: 4, kind: input, shape index: {}]   ;;  %s1374_s5 = inlined_call_operand.hbm [shape: bf16[128,256], index: 5, kind: input, shape index: {}]   ;;  %s1375_s6 = inlined_call_operand.vmem [shape: f32[1,256], index: 6, kind: input, shape index: {}]   ;;  %s1376_s7 = inlined_call_operand.hbm [shape: f32[50,256], index: 7, kind: output, shape index: {}]  }
   0x1   :  { %13 = vsyncpa [#allocation8], 0 }
   0x2   :  { %14 = vsyncpa [#allocation11], 0 }
   0x3   :  { %15 = vsyncpa [#allocation6], 0 }
   0x4   :  { %20 = vsyncadd [#allocation5], 128  ;;  %s1264_s24 = smov [#allocation7]   ;;  %s1265_s26 = smov [#allocation4]  }
   0x5   :  { %s33_s25 = sshll.u32 %s1264_s24, 4  ;;  %s21_s27 = sshll.u32 %s1265_s26, 4  ;;  %s34_s25 = int_to_ptr.vmem [resolvable:$true] %s33_s25  ;;  %s22_s27 = int_to_ptr.vmem [resolvable:$true] %s21_s27 }
   0x6   :  { %s1164_s28 = scalar_lea.vmem %s34_s25, 2048  ;;  %p1169_p1 = scmp.lt.s32.totalorder %s34_s25, %s34_s25 }
   0x7   :  { %p1165_p0 = scmp.ne.s32.totalorder %s34_s25, %s1164_s28  ;;  %p1170_p2 = scmp.lt.s32.totalorder %s1164_s28, %s1164_s28 }
   0x9   :  { %p1171_p3 = por %p1170_p2, %p1169_p1 }
   0xb   :  { %p1172_p4 = pnand %p1171_p3, %p1165_p0 }
   0xd   :  { %1175 = shalt.err (!%p1172_p4)
}
   0xe   :  { %s1266_s29 = smov 128   ;;  %s1267_s30 = smov 8  }
   0xf   :  { %39 = dma.hbm_to_vmem [thread:$0]  %s1370_s1, 2048, %s34_s25, [#allocation8], %s1266_s29, %s1266_s29, %s1267_s30  }
  0x10   :  { %s1184_s10 = scalar_lea.vmem %s22_s27, 896  ;;  %s1188_s11 = scalar_lea.vmem %s22_s27, 1024 }
  0x11   :  { %p1185_p5 = scmp.ne.s32.totalorder %s22_s27, %s1184_s10  ;;  %p1189_p6 = scmp.lt.s32.totalorder %s22_s27, %s22_s27 }
  0x12   :  { %p1190_p7 = scmp.lt.s32.totalorder %s1188_s11, %s1184_s10 }
  0x14   :  { %p1191_p8 = por %p1190_p7, %p1189_p6 }
  0x16   :  { %p1192_p9 = pnand %p1191_p8, %p1185_p5 }
  0x18   :  { %1195 = shalt.err (!%p1192_p9)
}
  0x19   :  { %27 = dma.hbm_to_vmem [thread:$0]  %s1369_s0, 896, %s22_s27, [#allocation5], %s1266_s29, %s1266_s29, %s1267_s30  }
  0x1a   :  { %s1268_s14 = smov [#allocation9]  }
  0x1b   :  { %s47_s15 = sshll.u32 %s1268_s14, 4  ;;  %s48_s15 = int_to_ptr.vmem [resolvable:$true] %s47_s15 }
  0x1c   :  { %s1204_s16 = scalar_lea.vmem %s48_s15, 2048  ;;  %p1209_p11 = scmp.lt.s32.totalorder %s48_s15, %s48_s15 }
  0x1d   :  { %p1205_p10 = scmp.ne.s32.totalorder %s48_s15, %s1204_s16  ;;  %p1210_p12 = scmp.lt.s32.totalorder %s1204_s16, %s1204_s16 }
  0x1f   :  { %p1211_p13 = por %p1210_p12, %p1209_p11 }
  0x21   :  { %p1212_p0 = pnand %p1211_p13, %p1205_p10 }
  0x23   :  { %1215 = shalt.err (!%p1212_p0)
}
  0x24   :  { %s1269_s1 = smov 64   ;;  %s1270_s17 = smov 4  }
  0x25   :  { %53 = dma.hbm_to_vmem [thread:$0]  %s1372_s3, 2048, %s48_s15, [#allocation8], %s1269_s1, %s1269_s1, %s1270_s17  }
  0x26   :  { %s1271_s20 = smov [#allocation10]  }
  0x27   :  { %s61_s21 = sshll.u32 %s1271_s20, 4  ;;  %s62_s21 = int_to_ptr.vmem [resolvable:$true] %s61_s21 }
  0x28   :  { %s1224_s0 = scalar_lea.vmem %s62_s21, 2048  ;;  %p1229_p2 = scmp.lt.s32.totalorder %s62_s21, %s62_s21 }
  0x29   :  { %p1225_p1 = scmp.ne.s32.totalorder %s62_s21, %s1224_s0  ;;  %p1230_p3 = scmp.lt.s32.totalorder %s1224_s0, %s1224_s0 }
  0x2b   :  { %p1231_p4 = por %p1230_p3, %p1229_p2 }
  0x2d   :  { %p1232_p5 = pnand %p1231_p4, %p1225_p1 }
  0x2f   :  { %1235 = shalt.err (!%p1232_p5)
}
  0x30   :  { %67 = dma.hbm_to_vmem [thread:$0]  %s1374_s5, 2048, %s62_s21, [#allocation11], %s1266_s29, %s1266_s29, %s1267_s30  }
  0x31   :  { %1256 = dma.done.wait [#allocation5], 1024  }
  0x32   :  { %1257 = vsyncadd [#allocation5], 4294966272 }
  0x33   :  { %1258 = dma.done.wait [#allocation8], 4096  }
  0x34   :  { %1259 = vsyncadd [#allocation8], 4294963200 }
  0x35   :  { %1260 = dma.done.wait [#allocation11], 2048  }
  0x36   :  { %1261 = vsyncadd [#allocation11], 4294965248  ;;  %v1272_v0 = vmov 0   ;;  %v1088_v1 = vld [vmem:[#allocation7 + $0x74] ss:$8 sps:$4 sm:$0xff]   ;;  %v1116_v16 = vld [vmem:[#allocation9 + $0x68] sm:$0xff]   ;;  %v117_v49 = vlaneseq }
  0x37   :  { %239 = vmatprep.mubr.bf16.mxu0 %v1272_v0  ;;  %v1090_v2 = vld [vmem:[#allocation7 + $0x70] ss:$8 sps:$4 sm:$0xff]   ;;  %207 = vmatprep.subr.bf16.mxu0 %v1088_v1  ;;  %v1091_v3 = vld [vmem:[#allocation7 + $0x64] ss:$8 sps:$4 sm:$0xff]   ;;  %v1093_v4 = vld [vmem:[#allocation7 + $0x60] ss:$8 sps:$4 sm:$0xff]  }
  0x38   :  { %208 = vmatpush1.bf16.msra.mxu0 %v1090_v2  ;;  %v1094_v5 = vld [vmem:[#allocation7 + $0x54] ss:$8 sps:$4 sm:$0xff]   ;;  %v1096_v6 = vld [vmem:[#allocation7 + $0x50] ss:$8 sps:$4 sm:$0xff]   ;;  %v1097_v7 = vld [vmem:[#allocation7 + $0x44] ss:$8 sps:$4 sm:$0xff]  }
  0x39   :  { %209 = vmatprep.subr.bf16.mxu0 %v1091_v3  ;;  %v1099_v8 = vld [vmem:[#allocation7 + $0x40] ss:$8 sps:$4 sm:$0xff]   ;;  %v1100_v9 = vld [vmem:[#allocation7 + $0x34] ss:$8 sps:$4 sm:$0xff]   ;;  %v1102_v10 = vld [vmem:[#allocation7 + $0x30] ss:$8 sps:$4 sm:$0xff]  }
  0x3a   :  { %v1103_v11 = vld [vmem:[#allocation7 + $0x24] ss:$8 sps:$4 sm:$0xff]   ;;  %v1112_v12 = vld [vmem:[#allocation9 + $0x78] sm:$0xff]   ;;  %v1114_v14 = vld [vmem:[#allocation9 + $0x70] sm:$0xff]   ;;  %v1342_v50 = vshrl.u32 %v117_v49, 7 }
  0x3b   :  { %v1113_v13 = vld [vmem:[#allocation9 + $0x38] sm:$0xff]   ;;  %1020 = vmatprep.subr.bf16.mxu1 %v1112_v12  ;;  %v1115_v15 = vld [vmem:[#allocation9 + $0x30] sm:$0xff]   ;;  %v1105_v17 = vld [vmem:[#allocation7 + $0x20] ss:$8 sps:$4 sm:$0xff]  }
  0x3c   :  { %210 = vmatpush1.bf16.msra.mxu0 %v1093_v4  ;;  %1021 = vmatpush3.bf16.msra.mxu1 %v1113_v13  ;;  %v1106_v18 = vld [vmem:[#allocation7 + $0x14] ss:$8 sps:$4 sm:$0xff]   ;;  %v1108_v19 = vld [vmem:[#allocation7 + $0x10] ss:$8 sps:$4 sm:$0xff]   ;;  %v1117_v20 = vld [vmem:[#allocation9 + $0x28] sm:$0xff]   ;;  %v123_v51 = vsub.s32 1, %v1342_v50 }
  0x3d   :  { %211 = vmatprep.subr.bf16.mxu0 %v1094_v5  ;;  %1022 = vmatprep.subr.bf16.mxu1 %v1114_v14  ;;  %v1118_v21 = vld [vmem:[#allocation9 + $0x60] sm:$0xff]   ;;  %v1120_v24 = vld [vmem:[#allocation9 + $0x58] sm:$0xff]   ;;  %v88_v27 = vld [vmem:[#allocation4 + $0x8] sm:$0xff]  ;;  %v119_v52 = vsub.s32 0, %v1342_v50 }
  0x3e   :  { %v1109_v22 = vld [vmem:[#allocation7 + $0x4] ss:$8 sps:$4 sm:$0xff]   ;;  %v1111_v25 = vld [vmem:[#allocation7] ss:$8 sps:$4 sm:$0xff]   ;;  %v1121_v28 = vld [vmem:[#allocation9 + $0x18] sm:$0xff]  }
  0x3f   :  { %v1119_v23 = vld [vmem:[#allocation9 + $0x20] sm:$0xff]   ;;  %v89_v30 = vld [vmem:[#allocation4 + $0x10] sm:$0xff]  ;;  %v90_v31 = vld [vmem:[#allocation4 + $0x18] sm:$0xff] }
  0x40   :  { %212 = vmatpush1.bf16.msra.mxu0 %v1096_v6  ;;  %1023 = vmatpush3.bf16.msra.mxu1 %v1115_v15  ;;  %v87_v26 = vld [vmem:[#allocation4] sm:$0xff]  ;;  %v96_v32 = vpack.c.bf16 %v90_v31, %v89_v30  ;;  %v92_v34 = vld [vmem:[#allocation4 + $0x28] sm:$0xff]  ;;  %v93_v36 = vld [vmem:[#allocation4 + $0x30] sm:$0xff] }
  0x41   :  { %213 = vmatprep.subr.bf16.mxu0 %v1097_v7  ;;  %1024 = vmatprep.subr.bf16.mxu1 %v1116_v16  ;;  %v95_v29 = vpack.c.bf16 %v88_v27, %v87_v26  ;;  %v91_v33 = vld [vmem:[#allocation4 + $0x20] sm:$0xff]  ;;  %v94_v37 = vld [vmem:[#allocation4 + $0x38] sm:$0xff]  ;;  %v1122_v39 = vld [vmem:[#allocation9 + $0x50] sm:$0xff]  }
  0x42   :  { %v97_v35 = vpack.c.bf16 %v92_v34, %v91_v33  ;;  %v98_v38 = vpack.c.bf16 %v94_v37, %v93_v36  ;;  %v1123_v40 = vld [vmem:[#allocation9 + $0x10] sm:$0xff]   ;;  %v1124_v41 = vld [vmem:[#allocation9 + $0x48] sm:$0xff]   ;;  %v1126_v43 = vld [vmem:[#allocation9 + $0x40] sm:$0xff]  }
  0x43   :  { %v1125_v42 = vld [vmem:[#allocation9 + $0x8] sm:$0xff]   ;;  %v1127_v44 = vld [vmem:[#allocation9] sm:$0xff]   ;;  %v1128_v45 = vld [vmem:[#allocation10 + $0x70] ss:$8 sps:$4 sm:$0xff]  }
  0x44   :  { %214 = vmatpush1.bf16.msra.mxu0 %v1099_v8  ;;  %1025 = vmatpush3.bf16.msra.mxu1 %v1117_v20  ;;  %v1130_v46 = vld [vmem:[#allocation10 + $0x74] ss:$8 sps:$4 sm:$0xff]   ;;  %v1133_v47 = vld [vmem:[#allocation10 + $0x64] ss:$8 sps:$4 sm:$0xff]   ;;  %v1131_v48 = vld [vmem:[#allocation10 + $0x60] ss:$8 sps:$4 sm:$0xff]  }
  0x45   :  { %215 = vmatprep.subr.bf16.mxu0 %v1100_v9  ;;  %1026 = vmatprep.subr.bf16.mxu1 %v1118_v21  ;;  %v115_v53 = vld [vmem:[%s1371_s2] sm:$0x3]  ;;  %v1136_v49 = vld [vmem:[#allocation10 + $0x54] ss:$8 sps:$4 sm:$0xff]  }
  0x46   :  { %v124_v55 = vrot.slane %v115_v53, %v123_v51  ;;  %v120_v56 = vrot.slane %v115_v53, %v119_v52  ;;  %v1134_v53 = vld [vmem:[#allocation10 + $0x50] ss:$8 sps:$4 sm:$0xff]  }
  0x48   :  { %216 = vmatpush1.bf16.msra.mxu0 %v1102_v10  ;;  %1027 = vmatpush3.bf16.msra.mxu1 %v1119_v23 }
  0x49   :  { %217 = vmatprep.subr.bf16.mxu0 %v1103_v11  ;;  %1028 = vmatprep.subr.bf16.mxu1 %v1120_v24 }
  0x4c   :  { %218 = vmatpush1.bf16.msra.mxu0 %v1105_v17  ;;  %1029 = vmatpush3.bf16.msra.mxu1 %v1121_v28 }
  0x4d   :  { %219 = vmatprep.subr.bf16.mxu0 %v1106_v18  ;;  %1030 = vmatprep.subr.bf16.mxu1 %v1122_v39 }
  0x50   :  { %220 = vmatpush1.bf16.msra.mxu0 %v1108_v19  ;;  %1031 = vmatpush3.bf16.msra.mxu1 %v1123_v40 }
  0x51   :  { %221 = vmatprep.subr.bf16.mxu0 %v1109_v22  ;;  %1032 = vmatprep.subr.bf16.mxu1 %v1124_v41 }
  0x54   :  { %222 = vmatpush1.bf16.msra.mxu0 %v1111_v25  ;;  %1033 = vmatpush3.bf16.msra.mxu1 %v1125_v42 }
  0x55   :  { %1034 = vmatprep.subr.bf16.mxu1 %v1126_v43  ;;  %788 = vmatprep.subr.bf16.mxu0 %v1130_v46 }
  0x57   :  { %240 = vmatmul.mubr.bf16.vlgmr.msra.gmra.mxu0 %v95_v29 }
  0x58   :  { %249 = vmatprep.mubr.bf16.mxu0 %v1272_v0  ;;  %1035 = vmatpush3.bf16.msra.mxu1 %v1127_v44 }
  0x59   :  { %1060 = vmatprep.subr.bf16.mxu1 %v1130_v46  ;;  %789 = vmatpush1.bf16.msra.mxu0 %v1128_v45 }
  0x5a   :  { %790 = vmatprep.subr.bf16.mxu0 %v1133_v47 }
  0x5d   :  { %791 = vmatpush1.bf16.msra.mxu0 %v1131_v48 }
  0x5e   :  { %792 = vmatprep.subr.bf16.mxu0 %v1136_v49 }
  0x5f   :  { %250 = vmatmul.mubr.bf16.gmra.mxu0 %v96_v32 }
  0x60   :  { %259 = vmatprep.mubr.bf16.mxu0 %v1272_v0 }
  0x61   :  { %793 = vmatpush1.bf16.msra.mxu0 %v1134_v53 }
  0x67   :  { %260 = vmatmul.mubr.bf16.gmra.mxu0 %v97_v35 }
  0x68   :  { %269 = vmatprep.mubr.bf16.mxu0 %v1272_v0 }
  0x6f   :  { %270 = vmatmul.mubr.bf16.gmra.mxu0 %v98_v38 }
  0x70   :  { %820 = vmatprep.mubr.bf16.mxu0 %v1272_v0 }
 0x117   :  { %v241_v54 = vpop.f32.mrf.mxu0 }
 0x118   :  { %v242_v61 = vadd.f32 %v241_v54, %v120_v56  ;;  %v1139_v54 = vld [vmem:[#allocation10 + $0x44] ss:$8 sps:$4 sm:$0xff]  }
 0x119   :  { %v243_v57 = vpop.f32.mrf.mxu0  ;;  %794 = vmatprep.subr.bf16.mxu0 %v1139_v54 }
 0x11a   :  { %v244_v59 = vadd.f32 %v243_v57, %v124_v55  ;;  %v280_v5 = vmax.f32 %v242_v61, 0.0  ;;  %v1140_v57 = vld [vmem:[#allocation10 + $0x30] ss:$8 sps:$4 sm:$0xff]  }
 0x11b   :  { %v245_v58 = vpop.f32.mrf.mxu0  ;;  %v1146_v61 = vld [vmem:[#allocation10 + $0x10] ss:$8 sps:$4 sm:$0xff]  }
 0x11c   :  { %v246_v60 = vadd.f32 %v245_v58, %v120_v56  ;;  %v281_v3 = vmax.f32 %v244_v59, 0.0  ;;  %v1145_v58 = vld [vmem:[#allocation10 + $0x24] ss:$8 sps:$4 sm:$0xff]   ;;  %v1143_v59 = vld [vmem:[#allocation10 + $0x20] ss:$8 sps:$4 sm:$0xff]  }
 0x11d   :  { %v247_v62 = vpop.f32.mrf.mxu0 }
 0x11e   :  { %v248_v63 = vadd.f32 %v247_v62, %v124_v55  ;;  %v282_v1 = vmax.f32 %v246_v60, 0.0  ;;  %v1148_v60 = vld [vmem:[#allocation10 + $0x14] ss:$8 sps:$4 sm:$0xff]   ;;  %v1151_v62 = vld [vmem:[#allocation10 + $0x4] ss:$8 sps:$4 sm:$0xff]  }
 0x11f   :  { %v251_v2 = vpop.f32.mrf.mxu0 }
 0x120   :  { %v283_v4 = vmax.f32 %v248_v63, 0.0  ;;  %v1012_v8 = vpack.c.bf16 %v282_v1, %v280_v5  ;;  %v252_v12 = vadd.f32 %v251_v2, %v120_v56  ;;  %v1149_v63 = vld [vmem:[#allocation10] ss:$8 sps:$4 sm:$0xff]  }
 0x121   :  { %v253_v6 = vpop.f32.mrf.mxu0 }
 0x122   :  { %v1013_v7 = vpack.c.bf16 %v283_v4, %v281_v3  ;;  %v254_v10 = vadd.f32 %v253_v6, %v124_v55  ;;  %v284_v19 = vmax.f32 %v252_v12, 0.0  ;;  %v920_v4 = vld [vmem:[%s1373_s4] ss:$0 sm:$0xff] }
 0x123   :  { %v255_v9 = vpop.f32.mrf.mxu0 }
 0x124   :  { %v256_v11 = vadd.f32 %v255_v9, %v120_v56  ;;  %567 = vmatprep.mubr.bf16.mxu1 %v1013_v7  ;;  %v285_v17 = vmax.f32 %v254_v10, 0.0 }
 0x125   :  { %v257_v13 = vpop.f32.mrf.mxu0  ;;  %568 = vmatmul.mubr.bf16.vlgmr.msra.gmra.mxu1 %v1012_v8 }
 0x126   :  { %v258_v14 = vadd.f32 %v257_v13, %v124_v55  ;;  %1068 = vmatpush1.bf16.msra.mxu1 %v1128_v45  ;;  %v286_v15 = vmax.f32 %v256_v11, 0.0 }
 0x127   :  { %v261_v16 = vpop.f32.mrf.mxu0  ;;  %1061 = vmatprep.subr.bf16.mxu1 %v1133_v47 }
 0x128   :  { %v287_v18 = vmax.f32 %v258_v14, 0.0  ;;  %v1014_v22 = vpack.c.bf16 %v286_v15, %v284_v19  ;;  %v262_v26 = vadd.f32 %v261_v16, %v120_v56 }
 0x129   :  { %v263_v20 = vpop.f32.mrf.mxu0 }
 0x12a   :  { %v1015_v21 = vpack.c.bf16 %v287_v18, %v285_v17  ;;  %1069 = vmatpush1.bf16.msra.mxu1 %v1131_v48  ;;  %v264_v24 = vadd.f32 %v263_v20, %v124_v55  ;;  %v288_v33 = vmax.f32 %v262_v26, 0.0 }
 0x12b   :  { %v265_v23 = vpop.f32.mrf.mxu0  ;;  %1062 = vmatprep.subr.bf16.mxu1 %v1136_v49 }
 0x12c   :  { %v266_v25 = vadd.f32 %v265_v23, %v120_v56  ;;  %575 = vmatprep.mubr.bf16.mxu1 %v1015_v21  ;;  %v289_v31 = vmax.f32 %v264_v24, 0.0 }
 0x12d   :  { %v267_v27 = vpop.f32.mrf.mxu0  ;;  %576 = vmatmul.mubr.bf16.gmra.mxu1 %v1014_v22 }
 0x12e   :  { %v268_v28 = vadd.f32 %v267_v27, %v124_v55  ;;  %v290_v29 = vmax.f32 %v266_v25, 0.0  ;;  %1070 = vmatpush1.bf16.msra.mxu1 %v1134_v53  ;;  %v672_v53 = vld [vmem:[%s1375_s6] sm:$0x3] }
 0x12f   :  { %v271_v30 = vpop.f32.mrf.mxu0  ;;  %1063 = vmatprep.subr.bf16.mxu1 %v1139_v54  ;;  %v677_v54 = vrot.slane %v672_v53, %v119_v52 }
 0x130   :  { %v291_v32 = vmax.f32 %v268_v28, 0.0  ;;  %v1016_v36 = vpack.c.bf16 %v290_v29, %v288_v33  ;;  %v272_v40 = vadd.f32 %v271_v30, %v120_v56 }
 0x131   :  { %v273_v34 = vpop.f32.mrf.mxu0 }
 0x132   :  { %v1017_v35 = vpack.c.bf16 %v291_v32, %v289_v31  ;;  %v274_v38 = vadd.f32 %v273_v34, %v124_v55  ;;  %v292_v46 = vmax.f32 %v272_v40, 0.0 }
 0x133   :  { %v275_v37 = vpop.f32.mrf.mxu0 }
 0x134   :  { %v276_v39 = vadd.f32 %v275_v37, %v120_v56  ;;  %583 = vmatprep.mubr.bf16.mxu1 %v1017_v35  ;;  %v293_v44 = vmax.f32 %v274_v38, 0.0  ;;  %v1137_v56 = vld [vmem:[#allocation10 + $0x40] ss:$8 sps:$4 sm:$0xff]  }
 0x135   :  { %v277_v41 = vpop.f32.mrf.mxu0  ;;  %584 = vmatmul.mubr.bf16.gmra.mxu1 %v1016_v36  ;;  %795 = vmatpush1.bf16.msra.mxu0 %v1137_v56 }
 0x136   :  { %v278_v42 = vadd.f32 %v277_v41, %v124_v55  ;;  %v294_v43 = vmax.f32 %v276_v39, 0.0  ;;  %1071 = vmatpush1.bf16.msra.mxu1 %v1137_v56  ;;  %v1142_v55 = vld [vmem:[#allocation10 + $0x34] ss:$8 sps:$4 sm:$0xff]   ;;  %v681_v56 = vrot.slane %v672_v53, %v123_v51 }
 0x137   :  { %796 = vmatprep.subr.bf16.mxu0 %v1142_v55  ;;  %1064 = vmatprep.subr.bf16.mxu1 %v1142_v55 }
 0x138   :  { %v295_v45 = vmax.f32 %v278_v42, 0.0  ;;  %v1018_v48 = vpack.c.bf16 %v294_v43, %v292_v46 }
 0x139   :  { %797 = vmatpush1.bf16.msra.mxu0 %v1140_v57 }
 0x13a   :  { %v1019_v47 = vpack.c.bf16 %v295_v45, %v293_v44  ;;  %1072 = vmatpush1.bf16.msra.mxu1 %v1140_v57  ;;  %798 = vmatprep.subr.bf16.mxu0 %v1145_v58 }
 0x13b   :  { %1065 = vmatprep.subr.bf16.mxu1 %v1145_v58 }
 0x13c   :  { %591 = vmatprep.mubr.bf16.mxu1 %v1019_v47 }
 0x13d   :  { %592 = vmatmul.mubr.bf16.gmra.mxu1 %v1018_v48  ;;  %799 = vmatpush1.bf16.msra.mxu0 %v1143_v59 }
 0x13e   :  { %840 = vmatprep.mubr.bf16.mxu1 %v1272_v0  ;;  %1073 = vmatpush1.bf16.msra.mxu1 %v1143_v59 }
 0x13f   :  { %800 = vmatprep.subr.bf16.mxu0 %v1148_v60  ;;  %1066 = vmatprep.subr.bf16.mxu1 %v1148_v60 }
 0x141   :  { %801 = vmatpush1.bf16.msra.mxu0 %v1146_v61 }
 0x142   :  { %1074 = vmatpush1.bf16.msra.mxu1 %v1146_v61  ;;  %802 = vmatprep.subr.bf16.mxu0 %v1151_v62 }
 0x143   :  { %1067 = vmatprep.subr.bf16.mxu1 %v1151_v62 }
 0x145   :  { %803 = vmatpush1.bf16.msra.mxu0 %v1149_v63 }
 0x146   :  { %1075 = vmatpush1.bf16.msra.mxu1 %v1149_v63 }
 0x1e5   :  { %v1036_v1 = vpop.f32.mrf.mxu1 }
 0x1e7   :  { %v1037_v2 = vpop.f32.mrf.mxu1 }
 0x1e8   :  { %v1038_v3 = vadd.f32 %v1037_v2, %v1036_v1 }
 0x1e9   :  { %v1039_v5 = vpop.f32.mrf.mxu1 }
 0x1ea   :  { %v570_v7 = vadd.f32 %v1038_v3, %v920_v4 }
 0x1eb   :  { %v1040_v6 = vpop.f32.mrf.mxu1 }
 0x1ec   :  { %v1041_v8 = vadd.f32 %v1040_v6, %v1039_v5  ;;  %v600_v12 = vmax.f32 %v570_v7, 0.0 }
 0x1ed   :  { %v1042_v9 = vpop.f32.mrf.mxu1 }
 0x1ee   :  { %v573_v10 = vadd.f32 %v1041_v8, %v920_v4 }
 0x1ef   :  { %v1043_v11 = vpop.f32.mrf.mxu1 }
 0x1f0   :  { %v601_v13 = vmax.f32 %v573_v10, 0.0  ;;  %v1044_v14 = vadd.f32 %v1043_v11, %v1042_v9 }
 0x1f1   :  { %v1045_v15 = vpop.f32.mrf.mxu1 }
 0x1f2   :  { %v992_v16 = vpack.c.bf16 %v601_v13, %v600_v12  ;;  %v578_v18 = vadd.f32 %v1044_v14, %v920_v4 }
 0x1f3   :  { %v1046_v17 = vpop.f32.mrf.mxu1 }
 0x1f4   :  { %993 = vst [vmem:[#allocation3] sm:$0xff] %v992_v16   ;;  %v1047_v19 = vadd.f32 %v1046_v17, %v1045_v15  ;;  %v602_v23 = vmax.f32 %v578_v18, 0.0 }
 0x1f5   :  { %v1048_v20 = vpop.f32.mrf.mxu1 }
 0x1f6   :  { %v581_v21 = vadd.f32 %v1047_v19, %v920_v4 }
 0x1f7   :  { %v1049_v22 = vpop.f32.mrf.mxu1 }
 0x1f8   :  { %v603_v24 = vmax.f32 %v581_v21, 0.0  ;;  %v1050_v25 = vadd.f32 %v1049_v22, %v1048_v20 }
 0x1f9   :  { %v1051_v26 = vpop.f32.mrf.mxu1 }
 0x1fa   :  { %v997_v27 = vpack.c.bf16 %v603_v24, %v602_v23  ;;  %v586_v30 = vadd.f32 %v1050_v25, %v920_v4 }
 0x1fb   :  { %v1052_v28 = vpop.f32.mrf.mxu1  ;;  %v1152_v29 = vld [vmem:[#allocation3] sm:$0xff]  }
 0x1fc   :  { %1009 = vst [vmem:[#allocation3 + $0x8] sm:$0xff] %v997_v27   ;;  %v1053_v31 = vadd.f32 %v1052_v28, %v1051_v26  ;;  %821 = vmatmul.mubr.bf16.vlgmr.msra.gmra.mxu0 %v1152_v29  ;;  %v604_v35 = vmax.f32 %v586_v30, 0.0 }
 0x1fd   :  { %v1054_v32 = vpop.f32.mrf.mxu1  ;;  %830 = vmatprep.mubr.bf16.mxu0 %v1272_v0 }
 0x1fe   :  { %v589_v33 = vadd.f32 %v1053_v31, %v920_v4 }
 0x1ff   :  { %v1055_v34 = vpop.f32.mrf.mxu1 }
 0x200   :  { %v605_v36 = vmax.f32 %v589_v33, 0.0  ;;  %v1056_v37 = vadd.f32 %v1055_v34, %v1054_v32 }
 0x201   :  { %v1057_v38 = vpop.f32.mrf.mxu1 }
 0x202   :  { %v1002_v39 = vpack.c.bf16 %v605_v36, %v604_v35  ;;  %v594_v42 = vadd.f32 %v1056_v37, %v920_v4 }
 0x203   :  { %v1058_v40 = vpop.f32.mrf.mxu1  ;;  %v1153_v41 = vld [vmem:[#allocation3 + $0x8] sm:$0xff]  }
 0x204   :  { %1010 = vst [vmem:[#allocation3 + $0x10] sm:$0xff] %v1002_v39   ;;  %v1059_v43 = vadd.f32 %v1058_v40, %v1057_v38  ;;  %831 = vmatmul.mubr.bf16.gmra.mxu0 %v1153_v41  ;;  %v606_v45 = vmax.f32 %v594_v42, 0.0 }
 0x206   :  { %v597_v44 = vadd.f32 %v1059_v43, %v920_v4 }
 0x208   :  { %v607_v46 = vmax.f32 %v597_v44, 0.0 }
 0x20a   :  { %v1007_v47 = vpack.c.bf16 %v607_v46, %v606_v45 }
 0x20b   :  { %v1154_v48 = vld [vmem:[#allocation3 + $0x10] sm:$0xff]  }
 0x20c   :  { %1011 = vst [vmem:[#allocation3 + $0x18] sm:$0xff] %v1007_v47   ;;  %841 = vmatmul.mubr.bf16.vlgmr.msra.gmra.mxu1 %v1154_v48 }
 0x20d   :  { %850 = vmatprep.mubr.bf16.mxu1 %v1272_v0 }
 0x213   :  { %v1155_v49 = vld [vmem:[#allocation3 + $0x18] sm:$0xff]  }
 0x214   :  { %851 = vmatmul.mubr.bf16.gmra.mxu1 %v1155_v49 }
 0x2bc   :  { %v822_v55 = vpop.f32.mrf.mxu0 }
 0x2bd   :  { %v823_v57 = vadd.f32 %v822_v55, %v677_v54 }
 0x2be   :  { %v824_v58 = vpop.f32.mrf.mxu0 }
 0x2bf   :  { %861 = vst [vmem:[#allocation12] sm:$0xff] %v823_v57  ;;  %v825_v59 = vadd.f32 %v824_v58, %v681_v56 }
 0x2c0   :  { %v826_v60 = vpop.f32.mrf.mxu0 }
 0x2c1   :  { %862 = vst [vmem:[#allocation12 + $0x8] sm:$0xff] %v825_v59  ;;  %v827_v0 = vadd.f32 %v826_v60, %v677_v54 }
 0x2c2   :  { %v828_v61 = vpop.f32.mrf.mxu0 }
 0x2c3   :  { %863 = vst [vmem:[#allocation12 + $0x10] sm:$0xff] %v827_v0  ;;  %v829_v62 = vadd.f32 %v828_v61, %v681_v56 }
 0x2c4   :  { %v832_v63 = vpop.f32.mrf.mxu0 }
 0x2c5   :  { %864 = vst [vmem:[#allocation12 + $0x18] sm:$0xff] %v829_v62  ;;  %v833_v1 = vadd.f32 %v832_v63, %v677_v54 }
 0x2c6   :  { %v834_v2 = vpop.f32.mrf.mxu0 }
 0x2c7   :  { %865 = vst [vmem:[#allocation12 + $0x20] sm:$0xff] %v833_v1  ;;  %v835_v52 = vadd.f32 %v834_v2, %v681_v56 }
 0x2c8   :  { %v836_v3 = vpop.f32.mrf.mxu0 }
 0x2c9   :  { %866 = vst [vmem:[#allocation12 + $0x28] sm:$0xff] %v835_v52  ;;  %v837_v50 = vadd.f32 %v836_v3, %v677_v54 }
 0x2ca   :  { %v838_v51 = vpop.f32.mrf.mxu0 }
 0x2cb   :  { %867 = vst [vmem:[#allocation12 + $0x30] sm:$0xff] %v837_v50  ;;  %v839_v4 = vadd.f32 %v838_v51, %v681_v56 }
 0x2cc   :  { %v842_v5 = vpop.f32.mrf.mxu1 }
 0x2cd   :  { %868 = vst [vmem:[#allocation12 + $0x38] sm:$0xff] %v839_v4  ;;  %v843_v6 = vadd.f32 %v842_v5, %v677_v54 }
 0x2ce   :  { %v844_v7 = vpop.f32.mrf.mxu1 }
 0x2cf   :  { %869 = vst [vmem:[#allocation12 + $0x40] sm:$0xff] %v843_v6  ;;  %v845_v8 = vadd.f32 %v844_v7, %v681_v56 }
 0x2d0   :  { %v846_v9 = vpop.f32.mrf.mxu1 }
 0x2d1   :  { %870 = vst [vmem:[#allocation12 + $0x48] sm:$0xff] %v845_v8  ;;  %v847_v10 = vadd.f32 %v846_v9, %v677_v54 }
 0x2d2   :  { %v848_v11 = vpop.f32.mrf.mxu1 }
 0x2d3   :  { %871 = vst [vmem:[#allocation12 + $0x50] sm:$0xff] %v847_v10  ;;  %v849_v12 = vadd.f32 %v848_v11, %v681_v56 }
 0x2d4   :  { %v852_v13 = vpop.f32.mrf.mxu1 }
 0x2d5   :  { %872 = vst [vmem:[#allocation12 + $0x58] sm:$0xff] %v849_v12  ;;  %v853_v14 = vadd.f32 %v852_v13, %v677_v54 }
 0x2d6   :  { %v854_v15 = vpop.f32.mrf.mxu1 }
 0x2d7   :  { %873 = vst [vmem:[#allocation12 + $0x60] sm:$0xff] %v853_v14  ;;  %v855_v16 = vadd.f32 %v854_v15, %v681_v56 }
 0x2d8   :  { %v856_v17 = vpop.f32.mrf.mxu1 }
 0x2d9   :  { %874 = vst [vmem:[#allocation12 + $0x68] sm:$0xff] %v855_v16  ;;  %v857_v18 = vadd.f32 %v856_v17, %v677_v54 }
 0x2da   :  { %v858_v19 = vpop.f32.mrf.mxu1 }
 0x2db   :  { %875 = vst [vmem:[#allocation12 + $0x70] sm:$0xff] %v857_v18  ;;  %v859_v20 = vadd.f32 %v858_v19, %v681_v56 }
 0x2dd   :  { %876 = vst [vmem:[#allocation12 + $0x78] sm:$0xff] %v859_v20 }
 0x2de   :  { %881 = vsyncadd [#allocation6], 256  ;;  %s1273_s6 = smov [#allocation12]  }
 0x2df   :  { %s882_s26 = sshll.u32 %s1273_s6, 4  ;;  %s883_s26 = int_to_ptr.vmem [resolvable:$true] %s882_s26 }
 0x2e0   :  { %s1236_s27 = scalar_lea.vmem %s883_s26, 1792  ;;  %s1240_s28 = scalar_lea.vmem %s883_s26, 2048 }
 0x2e1   :  { %p1237_p6 = scmp.ne.s32.totalorder %s883_s26, %s1236_s27  ;;  %p1241_p7 = scmp.lt.s32.totalorder %s883_s26, %s883_s26 }
 0x2e2   :  { %p1242_p8 = scmp.lt.s32.totalorder %s1240_s28, %s1236_s27 }
 0x2e4   :  { %p1243_p9 = por %p1242_p8, %p1241_p7 }
 0x2e6   :  { %p1244_p10 = pnand %p1243_p9, %p1237_p6 }
 0x2e8   :  { %1247 = shalt.err (!%p1244_p10)
}
 0x2e9   :  { %s1274_s29 = smov 256   ;;  %s1275_s30 = smov 16  }
 0x2ea   :  { %888 = dma.vmem_to_hbm [thread:$0]  %s883_s26, 1792, %s1376_s7, [#allocation6], %s1274_s29, %s1274_s29, %s1275_s30  }
 0x2eb   :  { %1262 = dma.done.wait [#allocation6], 2048  }
 0x2ec   :  { %1263 = vsyncadd [#allocation6], 4294965248 }
 0x2ed   :  { %892 = vsyncpa [#allocation5], 1 }
 0x2ee   :  { %893 = vsyncpa [#allocation8], 1 }
 0x2ef   :  { %894 = vsyncpa [#allocation11], 1 }
 0x2f0   :  { %895 = vsyncpa [#allocation6], 1 }

</bundles_post_ra>
